<compile_context>
chip_gen: v6e
topology: v6e:2x2x1
jax: 0.10.0
libtpu: 0.0.40
codegen_flags: <defaults>
</compile_context>

<pallas_src>
import jax
import jax.numpy as jnp
import numpy as np
from jax.experimental import pallas as pl
from jax.experimental.pallas import tpu as pltpu


def _swish_kernel(x_ref, o_ref):
    # Compute in f32 (accurate on all generations incl. v5e which has no bf16
    # VALU/EUP); cast back to the input dtype. Mem-bound, so the casts are free.
    x = x_ref[...].astype(jnp.float32)
    o_ref[...] = (x * jax.nn.sigmoid(x)).astype(o_ref.dtype)


_LANES = 128
_TARGET_BLOCK_BYTES = 4 * 1024 * 1024  # ~4 MiB per block buffer


def swish(x):
    """Swish / SiLU: x * sigmoid(x), elementwise, any shape."""
    orig_shape = x.shape
    orig_dtype = x.dtype
    n = x.size
    itemsize = np.dtype(orig_dtype).itemsize

    # Flatten to a lane-dense [rows, 128] slab. Contiguous reshapes are free;
    # we only pay a pad copy when n is not a multiple of 128 (rare for NN
    # activations).
    x_flat = x.reshape(-1)
    pad = (-n) % _LANES
    if pad:
        x_flat = jnp.pad(x_flat, (0, pad))
    rows = x_flat.size // _LANES
    x2d = x_flat.reshape(rows, _LANES)

    # ~4 MiB blocks amortize the per-grid-step overhead; clamp to the data so
    # small inputs run as a single full-extent block (no wasted DMA/compute).
    target_rows = max(8, _TARGET_BLOCK_BYTES // (_LANES * itemsize))
    if rows <= target_rows:
        tile_rows = rows                      # full-extent block: any rows OK
    else:
        tile_rows = (target_rows // 8) * 8    # keep sublane (8) alignment

    grid = (pl.cdiv(rows, tile_rows),)

    out2d = pl.pallas_call(
        _swish_kernel,
        out_shape=jax.ShapeDtypeStruct((rows, _LANES), orig_dtype),
        grid_spec=pltpu.PrefetchScalarGridSpec(
            num_scalar_prefetch=0,
            grid=grid,
            in_specs=[pl.BlockSpec((tile_rows, _LANES), lambda i: (i, 0))],
            out_specs=pl.BlockSpec((tile_rows, _LANES), lambda i: (i, 0)),
        ),
        compiler_params=pltpu.CompilerParams(
            dimension_semantics=("parallel",),
            # 2 buffers each for input+output at ~4 MiB = ~16 MiB working set;
            # raise above v5e's 16 MiB scoped default, still < v7x's 64 MiB.
            vmem_limit_bytes=32 * 1024 * 1024,
        ),
    )(x2d)

    out_flat = out2d.reshape(-1)
    if pad:
        out_flat = out_flat[:n]
    return out_flat.reshape(orig_shape)


if __name__ == "__main__":
    key = jax.random.PRNGKey(0)
    # NCHW-style input consistent with typical usage of this block.
    x = jax.random.normal(key, (2, 4, 16, 16), dtype=jnp.float32)

    out = swish(x)
    jax.block_until_ready(out)

    # Reference check against plain JAX.
    ref = x * jax.nn.sigmoid(x)
    assert out.shape == x.shape and out.dtype == x.dtype
    assert jnp.max(jnp.abs(out - ref)) < 1e-5

    print("KERNEL_OK")
</pallas_src>

<mosaic_0001>
module attributes {stable_mosaic.version = 11 : i64} {
  func.func @_swish_kernel(%arg0: i32, %arg1: memref<16x128xf32, #tpu.memory_space<vmem>>, %arg2: memref<16x128xf32, #tpu.memory_space<vmem>>) attributes {dimension_semantics = [#tpu.dimension_semantics<parallel>], iteration_bounds = array<i64: 1>, scalar_prefetch = 0 : i64, scratch_operands = 0 : i64, tpu.core_type = #tpu.core_type<tc>, window_params = [{transform_indices = @transform_0, window_bounds = array<i64: 16, 128>}, {transform_indices = @transform_1, window_bounds = array<i64: 16, 128>}]} {
    %c0 = arith.constant 0 : index
    %c0_0 = arith.constant 0 : index
    %0 = vector.load %arg1[%c0, %c0_0] : memref<16x128xf32, #tpu.memory_space<vmem>>, vector<16x128xf32>
    %1 = arith.negf %0 : vector<16x128xf32>
    %2 = math.exp %1 : vector<16x128xf32>
    %cst = arith.constant 1.000000e+00 : f32
    %3 = vector.broadcast %cst : f32 to vector<16x128xf32>
    %4 = arith.addf %3, %2 : vector<16x128xf32>
    %5 = arith.divf %3, %4 : vector<16x128xf32>
    %6 = arith.mulf %0, %5 : vector<16x128xf32>
    %c0_1 = arith.constant 0 : index
    %c0_2 = arith.constant 0 : index
    %7 = vector.load %arg2[%c0_1, %c0_2] : memref<16x128xf32, #tpu.memory_space<vmem>>, vector<16x128xf32>
    tpu.vector_store %arg2[%c0_1, %c0_2], %6 {strides = array<i32>} : memref<16x128xf32, #tpu.memory_space<vmem>>, vector<16x128xf32>,
    return
  }
  func.func @transform_0(%arg0: i32) -> (i32, i32) {
    %c0_i32 = arith.constant 0 : i32
    %c0_i32_0 = arith.constant 0 : i32
    return %arg0, %c0_i32 : i32, i32
  }
  func.func @transform_1(%arg0: i32) -> (i32, i32) {
    %c0_i32 = arith.constant 0 : i32
    %c0_i32_0 = arith.constant 0 : i32
    return %arg0, %c0_i32 : i32, i32
  }
}

</mosaic_0001>

<bundles_post_ra>
// kernel: tpu_custom_call.1
= control target key start
LH: loop header
LB: loop body
LE: loop exit
PB: predicated region body
PF: predicated region fallthrough
CT: control target
= control target key end

     0   :  { %6 = vsyncpa [#allocation3], 0  ;;  %s142_s0 = inlined_call_operand.hbm [shape: f32[16,128], index: 0, kind: input, shape index: {}]   ;;  %s143_s1 = inlined_call_operand.hbm [shape: f32[16,128], index: 1, kind: output, shape index: {}]  }
   0x1   :  { %7 = vsyncpa [#allocation4], 0  ;;  %s116_s6 = smov [#allocation2]  }
   0x2   :  { %s13_s7 = sshll.u32 %s116_s6, 4  ;;  %s14_s7 = int_to_ptr.vmem [resolvable:$true] %s13_s7 }
   0x3   :  { %s80_s8 = scalar_lea.vmem %s14_s7, 256  ;;  %p85_p1 = scmp.lt.s32.totalorder %s14_s7, %s14_s7 }
   0x4   :  { %p81_p0 = scmp.ne.s32.totalorder %s14_s7, %s80_s8  ;;  %p86_p2 = scmp.lt.s32.totalorder %s80_s8, %s80_s8 }
   0x6   :  { %p87_p3 = por %p86_p2, %p85_p1 }
   0x8   :  { %p88_p4 = pnand %p87_p3, %p81_p0 }
   0xa   :  { %91 = shalt.err (!%p88_p4)
}
   0xb   :  { %s117_s9 = smov 128   ;;  %s118_s10 = smov 8  }
   0xc   :  { %19 = dma.hbm_to_vmem [thread:$0]  %s142_s0, 256, %s14_s7, [#allocation3], %s117_s9, %s117_s9, %s118_s10  }
   0xd   :  { %112 = dma.done.wait [#allocation3], 256  }
   0xe   :  { %113 = vsyncadd [#allocation3], 4294967040  ;;  %v23_v0 = vld [vmem:[#allocation2] sm:$0xff]  ;;  %v24_v1 = vld [vmem:[#allocation2 + $0x8] sm:$0xff]  ;;  %s119_s13 = smov [#allocation5]  }
   0xf   :  { %v58_v2 = vmul.f32 -1.442695, %v23_v0  ;;  %v59_v3 = vmul.f32 -1.442695, %v24_v1  ;;  %s46_s14 = sshll.u32 %s119_s13, 4  ;;  %s47_s14 = int_to_ptr.vmem [resolvable:$true] %s46_s14 }
  0x10   :  { %s92_s0 = scalar_lea.vmem %s47_s14, 256  ;;  %p97_p6 = scmp.lt.s32.totalorder %s47_s14, %s47_s14 }
  0x11   :  { %64 = vpow2.f32 %v58_v2  ;;  %p93_p5 = scmp.ne.s32.totalorder %s47_s14, %s92_s0  ;;  %p98_p7 = scmp.lt.s32.totalorder %s92_s0, %s92_s0 }
  0x12   :  { %66 = vpow2.f32 %v59_v3 }
  0x13   :  { %p99_p8 = por %p98_p7, %p97_p6 }
  0x15   :  { %p100_p9 = pnand %p99_p8, %p93_p5 }
  0x1e   :  { %v65_v4 = vpop.eup %64 }
  0x1f   :  { %v67_v5 = vpop.eup %66  ;;  %v31_v6 = vadd.f32 1.0, %v65_v4 }
  0x20   :  { %v32_v7 = vadd.f32 1.0, %v67_v5 }
  0x21   :  { %68 = vrcp.f32 %v31_v6 }
  0x22   :  { %70 = vrcp.f32 %v32_v7 }
  0x2e   :  { %v69_v8 = vpop.eup %68 }
  0x2f   :  { %v71_v9 = vpop.eup %70  ;;  %v37_v10 = vmul.f32 %v69_v8, %v23_v0 }
  0x30   :  { %v38_v11 = vmul.f32 %v71_v9, %v24_v1 }
  0x31   :  { %39 = vst [vmem:[#allocation5] sm:$0xff] %v37_v10 }
  0x32   :  { %40 = vst [vmem:[#allocation5 + $0x8] sm:$0xff] %v38_v11 }
  0x33   :  { %103 = shalt.err (!%p100_p9)
}
  0x34   :  { %52 = dma.vmem_to_hbm [thread:$0]  %s47_s14, 256, %s143_s1, [#allocation4], %s117_s9, %s117_s9, %s118_s10  }
  0x35   :  { %114 = dma.done.wait [#allocation4], 256  }
  0x36   :  { %115 = vsyncadd [#allocation4], 4294967040 }
  0x37   :  { %56 = vsyncpa [#allocation3], 1 }
  0x38   :  { %57 = vsyncpa [#allocation4], 1 }

</bundles_post_ra>
